<compile_context>
chip_gen: v5e
topology: v5e:2x2
jax: 0.10.0
libtpu: 0.0.40
codegen_flags: <defaults>
</compile_context>

<pallas_src>
import functools

import jax
import jax.numpy as jnp
from jax.experimental import pallas as pl
from jax.experimental.pallas import tpu as pltpu

# ------------------------- model configuration (small) -----------------------
BATCH = 2
INPUT_DIM = 64                        # VanillaAutoEncoder(input_shape=64, ...)
HIDDEN_DIMS = [128, 64]               # hidden_layer_dimensions
LATENT = 32                           # latent_dimension
DIMS = [INPUT_DIM] + HIDDEN_DIMS + [LATENT]   # [64, 128, 64, 32]
LANE = 128                            # pad every layer width to one lane tile
N_ENC = len(DIMS) - 1                 # 3 encoder Linears
N_DEC = len(DIMS) - 1                 # 3 decoder Linears
N_LAYERS = N_ENC + N_DEC              # 6


def _round_up(n, m):
    return ((n + m - 1) // m) * m


# ------------------------------ Pallas kernel ---------------------------------


def fused_ae_kernel(x_ref, w_ref, b_ref, z_ref, recon_ref, *, n_enc, n_dec,
                    input_dim):
    """Whole forward pass for one batch tile.

    x_ref     : (TILE_B, input_dim)  f32   (unpadded feature dim)
    w_ref     : (n_layers, 128, 128) bf16  (zero-padded, VMEM-resident)
    b_ref     : (n_layers, 1, 128)   f32
    z_ref     : (TILE_B, 128)        f32   (latent, lane-padded)
    recon_ref : (TILE_B, 128)        f32   (reconstruction, lane-padded)
    """
    # ----- encoder: Linear + ReLU on every layer (incl. the latent one) -----
    # First layer contracts over the true input_dim; weight sliced statically.
    h = x_ref[...].astype(jnp.bfloat16)                     # (TILE_B, input_dim)
    y = jnp.dot(h, w_ref[0, :input_dim, :],
                preferred_element_type=jnp.float32) + b_ref[0]
    hf = jnp.maximum(y, 0.0)                                # f32 bias/ReLU (v5e path)
    for li in range(1, n_enc):
        h = hf.astype(jnp.bfloat16)                         # bf16 between layers
        y = jnp.dot(h, w_ref[li],
                    preferred_element_type=jnp.float32) + b_ref[li]
        hf = jnp.maximum(y, 0.0)

    z_ref[...] = hf                                         # lane-dense f32 store

    # ----- decoder: ReLU between Linears, none after the last ----------------
    for j in range(n_dec):
        li = n_enc + j
        h = hf.astype(jnp.bfloat16)
        y = jnp.dot(h, w_ref[li],
                    preferred_element_type=jnp.float32) + b_ref[li]
        hf = jnp.maximum(y, 0.0) if j != n_dec - 1 else y   # no final activation

    recon_ref[...] = hf                                     # lane-dense f32 store


# ------------------------------- parameters -----------------------------------


def init_params(key):
    """Unpadded f32 Linear weights (in, out) and biases (out,) for all 6 layers."""
    enc_pairs = list(zip(DIMS[:-1], DIMS[1:]))
    dec_dims = DIMS[::-1]
    dec_pairs = list(zip(dec_dims[:-1], dec_dims[1:]))
    pairs = enc_pairs + dec_pairs
    keys = jax.random.split(key, 2 * len(pairs))
    ws, bs = [], []
    for i, (din, dout) in enumerate(pairs):
        ws.append(0.1 * jax.random.normal(keys[2 * i], (din, dout), jnp.float32))
        bs.append(0.1 * jax.random.normal(keys[2 * i + 1], (dout,), jnp.float32))
    return ws, bs


def pack_params(ws, bs):
    """Stack all layers into 2 padded arrays: (6,128,128) bf16 + (6,1,128) f32.

    Padded rows/cols/lanes are exactly zero (invariant the kernel relies on).
    """
    n = len(ws)
    w_stack = jnp.zeros((n, LANE, LANE), jnp.float32)
    b_stack = jnp.zeros((n, 1, LANE), jnp.float32)
    for i, (w, b) in enumerate(zip(ws, bs)):
        w_stack = w_stack.at[i, : w.shape[0], : w.shape[1]].set(w)
        b_stack = b_stack.at[i, 0, : b.shape[0]].set(b)
    return w_stack.astype(jnp.bfloat16), b_stack


# ------------------------------ forward wrapper --------------------------------


def vanilla_autoencoder_forward(x, w_stack, b_stack):
    n, input_dim = x.shape
    n_layers = w_stack.shape[0]

    # Batch tile: 256 rows fills the 256-wide MXU on v6e/v7x (128 suffices on
    # v5e); tiny batches round up to a sublane multiple (8) for unmasked stores.
    tile_b = 256 if n >= 256 else _round_up(max(n, 1), 8)
    n_pad = _round_up(n, tile_b)
    if n_pad != n:
        x = jnp.pad(x, ((0, n_pad - n), (0, 0)))
    num_tiles = n_pad // tile_b

    kernel = functools.partial(
        fused_ae_kernel, n_enc=N_ENC, n_dec=N_DEC, input_dim=input_dim
    )

    # advisory cost estimate for the fused call
    flops = 2 * n_pad * (input_dim * LANE + (n_layers - 1) * LANE * LANE)
    bytes_accessed = (
        n_pad * input_dim * 4                    # x
        + n_layers * LANE * LANE * 2             # bf16 weight stack
        + n_layers * LANE * 4                    # f32 bias stack
        + 2 * n_pad * LANE * 4                   # z + recon
    )

    z_pad, recon_pad = pl.pallas_call(
        kernel,
        grid=(num_tiles,),
        in_specs=[
            pl.BlockSpec((tile_b, input_dim), lambda i: (i, 0)),      # x: batch-tiled
            pl.BlockSpec((n_layers, LANE, LANE), lambda i: (0, 0, 0)),  # weights: resident
            pl.BlockSpec((n_layers, 1, LANE), lambda i: (0, 0, 0)),     # biases: resident
        ],
        out_specs=(
            pl.BlockSpec((tile_b, LANE), lambda i: (i, 0)),
            pl.BlockSpec((tile_b, LANE), lambda i: (i, 0)),
        ),
        out_shape=(
            jax.ShapeDtypeStruct((n_pad, LANE), jnp.float32),   # z (lane-padded)
            jax.ShapeDtypeStruct((n_pad, LANE), jnp.float32),   # recon (lane-padded)
        ),
        compiler_params=pltpu.CompilerParams(
            dimension_semantics=("parallel",),   # shard batch tiles across v7x's 2 TCs
        ),
        cost_estimate=pl.CostEstimate(
            flops=flops, transcendentals=0, bytes_accessed=bytes_accessed
        ),
    )(x, w_stack, b_stack)

    # slice padding off in the wrapper (keeps the kernel stores lane-dense)
    z = z_pad[:n, :LATENT]
    recon = recon_pad[:n, :input_dim]
    return z, recon


# -------------------------------- references -----------------------------------


def _ref_forward_matching(x, w_stack, b_stack):
    """Pure-JAX reference with the kernel's exact numerics (bf16 ops, f32 acc)."""
    y = jnp.dot(x.astype(jnp.bfloat16), w_stack[0, :INPUT_DIM, :],
                preferred_element_type=jnp.float32) + b_stack[0]
    hf = jnp.maximum(y, 0.0)
    for li in range(1, N_ENC):
        y = jnp.dot(hf.astype(jnp.bfloat16), w_stack[li],
                    preferred_element_type=jnp.float32) + b_stack[li]
        hf = jnp.maximum(y, 0.0)
    z = hf[:, :LATENT]
    for j in range(N_DEC):
        li = N_ENC + j
        y = jnp.dot(hf.astype(jnp.bfloat16), w_stack[li],
                    preferred_element_type=jnp.float32) + b_stack[li]
        hf = jnp.maximum(y, 0.0) if j != N_DEC - 1 else y
    return z, hf[:, :INPUT_DIM]


def _ref_forward_f32(x, ws, bs):
    """Full f32 reference (PyTorch VanillaAutoEncoder numerics)."""
    h = x
    for i in range(N_ENC):
        h = jnp.maximum(h @ ws[i] + bs[i], 0.0)
    z = h
    for j in range(N_DEC):
        i = N_ENC + j
        h = h @ ws[i] + bs[i]
        if j != N_DEC - 1:
            h = jnp.maximum(h, 0.0)
    return z, h


# ----------------------------------- main --------------------------------------

if __name__ == "__main__":
    key = jax.random.PRNGKey(0)
    kx, kp = jax.random.split(key)
    x = jax.random.normal(kx, (BATCH, INPUT_DIM), jnp.float32)

    ws, bs = init_params(kp)
    w_stack, b_stack = pack_params(ws, bs)

    fwd = jax.jit(vanilla_autoencoder_forward)
    z, recon = fwd(x, w_stack, b_stack)
    jax.block_until_ready((z, recon))

    assert z.shape == (BATCH, LATENT)
    assert recon.shape == (BATCH, INPUT_DIM)
    assert bool(jnp.isfinite(z).all()) and bool(jnp.isfinite(recon).all())

    # exact-scheme reference (bf16 operands, f32 accumulation)
    z_m, r_m = jax.jit(_ref_forward_matching)(x, w_stack, b_stack)
    assert jnp.allclose(z, z_m, rtol=2e-2, atol=2e-2)
    assert jnp.allclose(recon, r_m, rtol=2e-2, atol=2e-2)

    # pure f32 reference (original module numerics) — loose bound on bf16 drift
    z_f, r_f = _ref_forward_f32(x, ws, bs)
    assert jnp.allclose(z, z_f, rtol=1e-1, atol=1e-1)
    assert jnp.allclose(recon, r_f, rtol=1e-1, atol=1e-1)

    print("KERNEL_OK")
</pallas_src>

<mosaic_0001>
module attributes {stable_mosaic.version = 11 : i64} {
  func.func @fused_ae_kernel(%arg0: i32, %arg1: memref<8x64xf32, #tpu.memory_space<vmem>>, %arg2: memref<6x128x128xbf16, #tpu.memory_space<vmem>>, %arg3: memref<6x1x128xf32, #tpu.memory_space<vmem>>, %arg4: memref<8x128xf32, #tpu.memory_space<vmem>>, %arg5: memref<8x128xf32, #tpu.memory_space<vmem>>) attributes {dimension_semantics = [#tpu.dimension_semantics<parallel>], iteration_bounds = array<i64: 1>, scalar_prefetch = 0 : i64, scratch_operands = 0 : i64, tpu.core_type = #tpu.core_type<tc>, window_params = [{transform_indices = @transform_0, window_bounds = array<i64: 8, 64>}, {pipeline_mode = #tpu.pipeline_mode<synchronous>, transform_indices = @transform_1, window_bounds = array<i64: 6, 128, 128>}, {pipeline_mode = #tpu.pipeline_mode<synchronous>, transform_indices = @transform_2, window_bounds = array<i64: 6, 1, 128>}, {transform_indices = @transform_3, window_bounds = array<i64: 8, 128>}, {transform_indices = @transform_4, window_bounds = array<i64: 8, 128>}]} {
    %c0 = arith.constant 0 : index
    %c0_0 = arith.constant 0 : index
    %0 = vector.load %arg1[%c0, %c0_0] : memref<8x64xf32, #tpu.memory_space<vmem>>, vector<8x64xf32>
    %1 = arith.truncf %0 : vector<8x64xf32> to vector<8x64xbf16>
    %c0_1 = arith.constant 0 : index
    %c0_2 = arith.constant 0 : index
    %c0_3 = arith.constant 0 : index
    %2 = vector.load %arg2[%c0_1, %c0_2, %c0_3] : memref<6x128x128xbf16, #tpu.memory_space<vmem>>, vector<1x64x128xbf16>
    %3 = vector.shape_cast %2 : vector<1x64x128xbf16> to vector<64x128xbf16>
    %cst = arith.constant dense<0.000000e+00> : vector<8x128xf32>
    %4 = tpu.matmul %1, %3, %cst {dimension_numbers = #tpu.dot_dimension_numbers<[1], [0], [0], [1], [0, 0, 1, 1], [], []>} : vector<8x64xbf16>, vector<64x128xbf16>, vector<8x128xf32> -> vector<8x128xf32>
    %c0_4 = arith.constant 0 : index
    %c0_5 = arith.constant 0 : index
    %c0_6 = arith.constant 0 : index
    %5 = vector.load %arg3[%c0_4, %c0_5, %c0_6] : memref<6x1x128xf32, #tpu.memory_space<vmem>>, vector<1x1x128xf32>
    %6 = vector.shape_cast %5 : vector<1x1x128xf32> to vector<1x128xf32>
    %7 = vector.broadcast %6 : vector<1x128xf32> to vector<8x128xf32>
    %8 = arith.addf %4, %7 : vector<8x128xf32>
    %cst_7 = arith.constant 0.000000e+00 : f32
    %9 = vector.broadcast %cst_7 : f32 to vector<8x128xf32>
    %10 = arith.maximumf %8, %9 : vector<8x128xf32>
    %11 = arith.truncf %10 : vector<8x128xf32> to vector<8x128xbf16>
    %c1 = arith.constant 1 : index
    %c0_8 = arith.constant 0 : index
    %c0_9 = arith.constant 0 : index
    %12 = vector.load %arg2[%c1, %c0_8, %c0_9] : memref<6x128x128xbf16, #tpu.memory_space<vmem>>, vector<1x128x128xbf16>
    %13 = vector.shape_cast %12 : vector<1x128x128xbf16> to vector<128x128xbf16>
    %cst_10 = arith.constant dense<0.000000e+00> : vector<8x128xf32>
    %14 = tpu.matmul %11, %13, %cst_10 {dimension_numbers = #tpu.dot_dimension_numbers<[1], [0], [0], [1], [0, 0, 1, 1], [], []>} : vector<8x128xbf16>, vector<128x128xbf16>, vector<8x128xf32> -> vector<8x128xf32>
    %c1_11 = arith.constant 1 : index
    %c0_12 = arith.constant 0 : index
    %c0_13 = arith.constant 0 : index
    %15 = vector.load %arg3[%c1_11, %c0_12, %c0_13] : memref<6x1x128xf32, #tpu.memory_space<vmem>>, vector<1x1x128xf32>
    %16 = vector.shape_cast %15 : vector<1x1x128xf32> to vector<1x128xf32>
    %17 = vector.broadcast %16 : vector<1x128xf32> to vector<8x128xf32>
    %18 = arith.addf %14, %17 : vector<8x128xf32>
    %cst_14 = arith.constant 0.000000e+00 : f32
    %19 = vector.broadcast %cst_14 : f32 to vector<8x128xf32>
    %20 = arith.maximumf %18, %19 : vector<8x128xf32>
    %21 = arith.truncf %20 : vector<8x128xf32> to vector<8x128xbf16>
    %c2 = arith.constant 2 : index
    %c0_15 = arith.constant 0 : index
    %c0_16 = arith.constant 0 : index
    %22 = vector.load %arg2[%c2, %c0_15, %c0_16] : memref<6x128x128xbf16, #tpu.memory_space<vmem>>, vector<1x128x128xbf16>
    %23 = vector.shape_cast %22 : vector<1x128x128xbf16> to vector<128x128xbf16>
    %cst_17 = arith.constant dense<0.000000e+00> : vector<8x128xf32>
    %24 = tpu.matmul %21, %23, %cst_17 {dimension_numbers = #tpu.dot_dimension_numbers<[1], [0], [0], [1], [0, 0, 1, 1], [], []>} : vector<8x128xbf16>, vector<128x128xbf16>, vector<8x128xf32> -> vector<8x128xf32>
    %c2_18 = arith.constant 2 : index
    %c0_19 = arith.constant 0 : index
    %c0_20 = arith.constant 0 : index
    %25 = vector.load %arg3[%c2_18, %c0_19, %c0_20] : memref<6x1x128xf32, #tpu.memory_space<vmem>>, vector<1x1x128xf32>
    %26 = vector.shape_cast %25 : vector<1x1x128xf32> to vector<1x128xf32>
    %27 = vector.broadcast %26 : vector<1x128xf32> to vector<8x128xf32>
    %28 = arith.addf %24, %27 : vector<8x128xf32>
    %cst_21 = arith.constant 0.000000e+00 : f32
    %29 = vector.broadcast %cst_21 : f32 to vector<8x128xf32>
    %30 = arith.maximumf %28, %29 : vector<8x128xf32>
    %c0_22 = arith.constant 0 : index
    %c0_23 = arith.constant 0 : index
    %31 = vector.load %arg4[%c0_22, %c0_23] : memref<8x128xf32, #tpu.memory_space<vmem>>, vector<8x128xf32>
    tpu.vector_store %arg4[%c0_22, %c0_23], %30 {strides = array<i32>} : memref<8x128xf32, #tpu.memory_space<vmem>>, vector<8x128xf32>,
    %32 = arith.truncf %30 : vector<8x128xf32> to vector<8x128xbf16>
    %c3 = arith.constant 3 : index
    %c0_24 = arith.constant 0 : index
    %c0_25 = arith.constant 0 : index
    %33 = vector.load %arg2[%c3, %c0_24, %c0_25] : memref<6x128x128xbf16, #tpu.memory_space<vmem>>, vector<1x128x128xbf16>
    %34 = vector.shape_cast %33 : vector<1x128x128xbf16> to vector<128x128xbf16>
    %cst_26 = arith.constant dense<0.000000e+00> : vector<8x128xf32>
    %35 = tpu.matmul %32, %34, %cst_26 {dimension_numbers = #tpu.dot_dimension_numbers<[1], [0], [0], [1], [0, 0, 1, 1], [], []>} : vector<8x128xbf16>, vector<128x128xbf16>, vector<8x128xf32> -> vector<8x128xf32>
    %c3_27 = arith.constant 3 : index
    %c0_28 = arith.constant 0 : index
    %c0_29 = arith.constant 0 : index
    %36 = vector.load %arg3[%c3_27, %c0_28, %c0_29] : memref<6x1x128xf32, #tpu.memory_space<vmem>>, vector<1x1x128xf32>
    %37 = vector.shape_cast %36 : vector<1x1x128xf32> to vector<1x128xf32>
    %38 = vector.broadcast %37 : vector<1x128xf32> to vector<8x128xf32>
    %39 = arith.addf %35, %38 : vector<8x128xf32>
    %cst_30 = arith.constant 0.000000e+00 : f32
    %40 = vector.broadcast %cst_30 : f32 to vector<8x128xf32>
    %41 = arith.maximumf %39, %40 : vector<8x128xf32>
    %42 = arith.truncf %41 : vector<8x128xf32> to vector<8x128xbf16>
    %c4 = arith.constant 4 : index
    %c0_31 = arith.constant 0 : index
    %c0_32 = arith.constant 0 : index
    %43 = vector.load %arg2[%c4, %c0_31, %c0_32] : memref<6x128x128xbf16, #tpu.memory_space<vmem>>, vector<1x128x128xbf16>
    %44 = vector.shape_cast %43 : vector<1x128x128xbf16> to vector<128x128xbf16>
    %cst_33 = arith.constant dense<0.000000e+00> : vector<8x128xf32>
    %45 = tpu.matmul %42, %44, %cst_33 {dimension_numbers = #tpu.dot_dimension_numbers<[1], [0], [0], [1], [0, 0, 1, 1], [], []>} : vector<8x128xbf16>, vector<128x128xbf16>, vector<8x128xf32> -> vector<8x128xf32>
    %c4_34 = arith.constant 4 : index
    %c0_35 = arith.constant 0 : index
    %c0_36 = arith.constant 0 : index
    %46 = vector.load %arg3[%c4_34, %c0_35, %c0_36] : memref<6x1x128xf32, #tpu.memory_space<vmem>>, vector<1x1x128xf32>
    %47 = vector.shape_cast %46 : vector<1x1x128xf32> to vector<1x128xf32>
    %48 = vector.broadcast %47 : vector<1x128xf32> to vector<8x128xf32>
    %49 = arith.addf %45, %48 : vector<8x128xf32>
    %cst_37 = arith.constant 0.000000e+00 : f32
    %50 = vector.broadcast %cst_37 : f32 to vector<8x128xf32>
    %51 = arith.maximumf %49, %50 : vector<8x128xf32>
    %52 = arith.truncf %51 : vector<8x128xf32> to vector<8x128xbf16>
    %c5 = arith.constant 5 : index
    %c0_38 = arith.constant 0 : index
    %c0_39 = arith.constant 0 : index
    %53 = vector.load %arg2[%c5, %c0_38, %c0_39] : memref<6x128x128xbf16, #tpu.memory_space<vmem>>, vector<1x128x128xbf16>
    %54 = vector.shape_cast %53 : vector<1x128x128xbf16> to vector<128x128xbf16>
    %cst_40 = arith.constant dense<0.000000e+00> : vector<8x128xf32>
    %55 = tpu.matmul %52, %54, %cst_40 {dimension_numbers = #tpu.dot_dimension_numbers<[1], [0], [0], [1], [0, 0, 1, 1], [], []>} : vector<8x128xbf16>, vector<128x128xbf16>, vector<8x128xf32> -> vector<8x128xf32>
    %c5_41 = arith.constant 5 : index
    %c0_42 = arith.constant 0 : index
    %c0_43 = arith.constant 0 : index
    %56 = vector.load %arg3[%c5_41, %c0_42, %c0_43] : memref<6x1x128xf32, #tpu.memory_space<vmem>>, vector<1x1x128xf32>
    %57 = vector.shape_cast %56 : vector<1x1x128xf32> to vector<1x128xf32>
    %58 = vector.broadcast %57 : vector<1x128xf32> to vector<8x128xf32>
    %59 = arith.addf %55, %58 : vector<8x128xf32>
    %c0_44 = arith.constant 0 : index
    %c0_45 = arith.constant 0 : index
    %60 = vector.load %arg5[%c0_44, %c0_45] : memref<8x128xf32, #tpu.memory_space<vmem>>, vector<8x128xf32>
    tpu.vector_store %arg5[%c0_44, %c0_45], %59 {strides = array<i32>} : memref<8x128xf32, #tpu.memory_space<vmem>>, vector<8x128xf32>,
    return
  }
  func.func @transform_0(%arg0: i32) -> (i32, i32) {
    %c0_i32 = arith.constant 0 : i32
    %c0_i32_0 = arith.constant 0 : i32
    return %arg0, %c0_i32 : i32, i32
  }
  func.func @transform_1(%arg0: i32) -> (i32, i32, i32) {
    %c0_i32 = arith.constant 0 : i32
    %c0_i32_0 = arith.constant 0 : i32
    %c0_i32_1 = arith.constant 0 : i32
    %c0_i32_2 = arith.constant 0 : i32
    return %c0_i32, %c0_i32_0, %c0_i32_1 : i32, i32, i32
  }
  func.func @transform_2(%arg0: i32) -> (i32, i32, i32) {
    %c0_i32 = arith.constant 0 : i32
    %c0_i32_0 = arith.constant 0 : i32
    %c0_i32_1 = arith.constant 0 : i32
    %c0_i32_2 = arith.constant 0 : i32
    return %c0_i32, %c0_i32_0, %c0_i32_1 : i32, i32, i32
  }
  func.func @transform_3(%arg0: i32) -> (i32, i32) {
    %c0_i32 = arith.constant 0 : i32
    %c0_i32_0 = arith.constant 0 : i32
    return %arg0, %c0_i32 : i32, i32
  }
  func.func @transform_4(%arg0: i32) -> (i32, i32) {
    %c0_i32 = arith.constant 0 : i32
    %c0_i32_0 = arith.constant 0 : i32
    return %arg0, %c0_i32 : i32, i32
  }
}

</mosaic_0001>

<bundles_post_ra>
// kernel: vanilla_autoencoder_forward.1
= control target key start
LH: loop header
LB: loop body
LE: loop exit
PB: predicated region body
PF: predicated region fallthrough
CT: control target
= control target key end

     0   :  { %10 = vsyncpa [#allocation3], 0  ;;  %s785_s18 = smov [#allocation2]   ;;  %s786_s20 = smov 64   ;;  %s843_s0 = inlined_call_operand.vmem [shape: f32[8,64], index: 0, kind: input, shape index: {}]   ;;  %s844_s1 = inlined_call_operand.hbm [shape: bf16[6,128,128], index: 1, kind: input, shape index: {}]   ;;  %s845_s2 = inlined_call_operand.vmem [shape: f32[6,1,128], index: 2, kind: input, shape index: {}]   ;;  %s846_s3 = inlined_call_operand.vmem [shape: f32[8,128], index: 3, kind: output, shape index: {0}]   ;;  %s847_s4 = inlined_call_operand.vmem [shape: f32[8,128], index: 4, kind: output, shape index: {1}]  }
   0x1   :  { %s17_s17 = sshll.u32 %s844_s1, 4  ;;  %s19_s19 = sshll.u32 %s785_s18, 4  ;;  %s18_s17 = int_to_ptr.hbm [resolvable:$true] %s17_s17  ;;  %s20_s19 = int_to_ptr.vmem [resolvable:$true] %s19_s19 }
   0x2   :  { %s787_s21 = smov 4  }
   0x3   :  { %25 = dma.hbm_to_vmem [thread:$0]  %s18_s17, 6144, %s20_s19, [#allocation3], %s786_s20, %s786_s20, %s787_s21  }
   0x4   :  { %783 = dma.done.wait [#allocation3], 6144  }
   0x5   :  { %784 = vsyncadd [#allocation3], 4294961152  ;;  %v709_v0 = vld [vmem:[#allocation2 + $0x18] sm:$0xff]  ;;  %v708_v2 = vld [vmem:[#allocation2 + $0x10] sm:$0xff]  ;;  %vm71_vm0 = vcmask 523264  }
   0x6   :  { %v717_v1 = vld [vmem:[#allocation2 + $0x78] sm:$0xff]  ;;  %79 = vmatpush.bf16.msra.mxu0 %v709_v0  ;;  %v716_v3 = vld [vmem:[#allocation2 + $0x70] sm:$0xff]  ;;  %v707_v4 = vld [vmem:[#allocation2 + $0x8] sm:$0xff] }
   0x7   :  { %160 = vmatpush.bf16.msra.mxu1 %v717_v1  ;;  %v715_v5 = vld [vmem:[#allocation2 + $0x68] sm:$0xff]  ;;  %v706_v6 = vld [vmem:[#allocation2] sm:$0xff]  ;;  %v713_v10 = vld [vmem:[#allocation2 + $0x58] sm:$0xff] }
   0x8   :  { %v33_v7 = vld [vmem:[%s843_s0] sm:$0xff]  ;;  %v712_v11 = vld [vmem:[#allocation2 + $0x50] sm:$0xff]  ;;  %v711_v12 = vld [vmem:[#allocation2 + $0x48] sm:$0xff] }
   0x9   :  { %v714_v8 = vld [vmem:[#allocation2 + $0x60] sm:$0xff]  ;;  %v34_v9 = vpack.c.bf16 %v33_v7, %v33_v7  ;;  %v725_v14 = vld [vmem:[#allocation2 + $0xb8] sm:$0xff]  ;;  %v724_v15 = vld [vmem:[#allocation2 + $0xb0] sm:$0xff] }
   0xa   :  { %80 = vmatpush.bf16.msra.mxu0 %v708_v2  ;;  %v710_v13 = vld [vmem:[#allocation2 + $0x40] sm:$0xff]  ;;  %245 = vmatpush.bf16.msra.mxu2 %v725_v14  ;;  %v723_v16 = vld [vmem:[#allocation2 + $0xa8] sm:$0xff]  ;;  %v721_v18 = vld [vmem:[#allocation2 + $0x98] sm:$0xff] }
   0xb   :  { %161 = vmatpush.bf16.msra.mxu1 %v716_v3  ;;  %v722_v17 = vld [vmem:[#allocation2 + $0xa0] sm:$0xff]  ;;  %v720_v19 = vld [vmem:[#allocation2 + $0x90] sm:$0xff]  ;;  %v719_v26 = vld [vmem:[#allocation2 + $0x88] sm:$0xff] }
   0xc   :  { %v753_v20 = vld [vmem:[%s845_s2] ss:$0 sm:$0xff]  ;;  %v733_v28 = vld [vmem:[#allocation2 + $0xf8] sm:$0xff]  ;;  %v732_v29 = vld [vmem:[#allocation2 + $0xf0] sm:$0xff] }
   0xd   :  { %v718_v27 = vld [vmem:[#allocation2 + $0x80] sm:$0xff]  ;;  %331 = vmatpush.bf16.msra.mxu3 %v733_v28  ;;  %v731_v30 = vld [vmem:[#allocation2 + $0xe8] sm:$0xff]  ;;  %v729_v32 = vld [vmem:[#allocation2 + $0xd8] sm:$0xff] }
   0xe   :  { %81 = vmatpush.bf16.msra.mxu0 %v707_v4  ;;  %246 = vmatpush.bf16.msra.mxu2 %v724_v15  ;;  %v730_v31 = vld [vmem:[#allocation2 + $0xe0] sm:$0xff]  ;;  %v728_v33 = vld [vmem:[#allocation2 + $0xd0] sm:$0xff]  ;;  %v727_v40 = vld [vmem:[#allocation2 + $0xc8] sm:$0xff] }
   0xf   :  { %162 = vmatpush.bf16.msra.mxu1 %v715_v5  ;;  %v754_v34 = vld [vmem:[%s845_s2 + $0x1] ss:$0 sm:$0xff]  ;;  %v741_v42 = vld [vmem:[#allocation2 + $0x138] sm:$0xff]  ;;  %v740_v43 = vld [vmem:[#allocation2 + $0x130] sm:$0xff] }
  0x10   :  { %v726_v41 = vld [vmem:[#allocation2 + $0xc0] sm:$0xff]  ;;  %v739_v44 = vld [vmem:[#allocation2 + $0x128] sm:$0xff]  ;;  %v737_v46 = vld [vmem:[#allocation2 + $0x118] sm:$0xff] }
  0x11   :  { %332 = vmatpush.bf16.msra.mxu3 %v732_v29  ;;  %v738_v45 = vld [vmem:[#allocation2 + $0x120] sm:$0xff]  ;;  %v736_v47 = vld [vmem:[#allocation2 + $0x110] sm:$0xff]  ;;  %v735_v54 = vld [vmem:[#allocation2 + $0x108] sm:$0xff] }
  0x12   :  { %82 = vmatpush.bf16.msra.mxu0 %v706_v6  ;;  %247 = vmatpush.bf16.msra.mxu2 %v723_v16  ;;  %v755_v48 = vld [vmem:[%s845_s2 + $0x2] ss:$0 sm:$0xff]  ;;  %v749_v56 = vld [vmem:[#allocation2 + $0x178] sm:$0xff]  ;;  %v748_v57 = vld [vmem:[#allocation2 + $0x170] sm:$0xff] }
  0x13   :  { %163 = vmatpush.bf16.msra.mxu1 %v714_v8  ;;  %v734_v55 = vld [vmem:[#allocation2 + $0x100] sm:$0xff]  ;;  %v747_v58 = vld [vmem:[#allocation2 + $0x168] sm:$0xff]  ;;  %v745_v60 = vld [vmem:[#allocation2 + $0x158] sm:$0xff] }
  0x14   :  { %v746_v59 = vld [vmem:[#allocation2 + $0x160] sm:$0xff]  ;;  %v744_v61 = vld [vmem:[#allocation2 + $0x150] sm:$0xff]  ;;  %v743_v4 = vld [vmem:[#allocation2 + $0x148] sm:$0xff] }
  0x15   :  { %540 = vmatmul.msk.bf16.vlgmr.msra.gmra.mxu0 %vm71_vm0, %v34_v9  ;;  %333 = vmatpush.bf16.msra.mxu3 %v731_v30  ;;  %v756_v62 = vld [vmem:[%s845_s2 + $0x3] ss:$0 sm:$0xff]  ;;  %v757_v6 = vld [vmem:[%s845_s2 + $0x4] ss:$0 sm:$0xff] }
  0x16   :  { %248 = vmatpush.bf16.msra.mxu2 %v722_v17  ;;  %416 = vmatpush.bf16.msrb.mxu0 %v741_v42  ;;  %v742_v5 = vld [vmem:[#allocation2 + $0x140] sm:$0xff] }
  0x17   :  { %164 = vmatpush.bf16.msra.mxu1 %v713_v10 }
  0x19   :  { %334 = vmatpush.bf16.msra.mxu3 %v730_v31 }
  0x1a   :  { %249 = vmatpush.bf16.msra.mxu2 %v721_v18  ;;  %417 = vmatpush.bf16.msrb.mxu0 %v740_v43 }
  0x1b   :  { %165 = vmatpush.bf16.msra.mxu1 %v712_v11 }
  0x1d   :  { %335 = vmatpush.bf16.msra.mxu3 %v729_v32 }
  0x1e   :  { %250 = vmatpush.bf16.msra.mxu2 %v720_v19  ;;  %418 = vmatpush.bf16.msrb.mxu0 %v739_v44 }
  0x1f   :  { %166 = vmatpush.bf16.msra.mxu1 %v711_v12  ;;  %v758_v12 = vld [vmem:[%s845_s2 + $0x5] ss:$0 sm:$0xff] }
  0x21   :  { %336 = vmatpush.bf16.msra.mxu3 %v728_v33 }
  0x22   :  { %251 = vmatpush.bf16.msra.mxu2 %v719_v26  ;;  %419 = vmatpush.bf16.msrb.mxu0 %v738_v45 }
  0x23   :  { %167 = vmatpush.bf16.msra.mxu1 %v710_v13 }
  0x25   :  { %337 = vmatpush.bf16.msra.mxu3 %v727_v40 }
  0x26   :  { %252 = vmatpush.bf16.msra.mxu2 %v718_v27  ;;  %420 = vmatpush.bf16.msrb.mxu0 %v737_v46 }
  0x27   :  { %501 = vmatpush.bf16.msrb.mxu1 %v749_v56 }
  0x29   :  { %338 = vmatpush.bf16.msra.mxu3 %v726_v41 }
  0x2a   :  { %421 = vmatpush.bf16.msrb.mxu0 %v736_v47 }
  0x2b   :  { %502 = vmatpush.bf16.msrb.mxu1 %v748_v57 }
  0x2e   :  { %422 = vmatpush.bf16.msrb.mxu0 %v735_v54 }
  0x2f   :  { %503 = vmatpush.bf16.msrb.mxu1 %v747_v58 }
  0x32   :  { %423 = vmatpush.bf16.msrb.mxu0 %v734_v55 }
  0x33   :  { %504 = vmatpush.bf16.msrb.mxu1 %v746_v59 }
  0x37   :  { %505 = vmatpush.bf16.msrb.mxu1 %v745_v60 }
  0x3b   :  { %506 = vmatpush.bf16.msrb.mxu1 %v744_v61 }
  0x3f   :  { %507 = vmatpush.bf16.msrb.mxu1 %v743_v4 }
  0x43   :  { %508 = vmatpush.bf16.msrb.mxu1 %v742_v5 }
  0x92   :  { %v84_v21 = vpop.f32.mrf.mxu0 }
  0x93   :  { %v85_v22 = vadd.f32 %v753_v20, %v84_v21 }
  0x95   :  { %v88_v23 = vmax.f32 %v85_v22, 0.0 }
  0x97   :  { %v89_v24 = vpack.c.bf16 %v88_v23, %v88_v23 }
  0x99   :  { %168 = vmatmul.bf16.vlgmr.msra.gmra.mxu1 %v89_v24 }
  0x9a   :  { %v86_v25 = vpop.f32.mrf.mxu0 }
 0x116   :  { %v169_v35 = vpop.f32.mrf.mxu1 }
 0x117   :  { %v170_v36 = vadd.f32 %v754_v34, %v169_v35 }
 0x119   :  { %v173_v37 = vmax.f32 %v170_v36, 0.0 }
 0x11b   :  { %v174_v38 = vpack.c.bf16 %v173_v37, %v173_v37 }
 0x11d   :  { %253 = vmatmul.bf16.vlgmr.msra.gmra.mxu2 %v174_v38 }
 0x11e   :  { %v171_v39 = vpop.f32.mrf.mxu1 }
 0x1a0   :  { %v254_v49 = vpop.f32.mrf.mxu2 }
 0x1a1   :  { %v255_v50 = vadd.f32 %v755_v48, %v254_v49 }
 0x1a3   :  { %v258_v51 = vmax.f32 %v255_v50, 0.0 }
 0x1a5   :  { %259 = vst [vmem:[%s846_s3] sm:$0xff] %v258_v51  ;;  %v260_v52 = vpack.c.bf16 %v258_v51, %v258_v51 }
 0x1a7   :  { %339 = vmatmul.bf16.vlgmr.msra.gmra.mxu3 %v260_v52 }
 0x1a8   :  { %v256_v53 = vpop.f32.mrf.mxu2 }
 0x22a   :  { %v340_v63 = vpop.f32.mrf.mxu3 }
 0x22b   :  { %v341_v0 = vadd.f32 %v756_v62, %v340_v63 }
 0x22d   :  { %v344_v1 = vmax.f32 %v341_v0, 0.0 }
 0x22f   :  { %v345_v2 = vpack.c.bf16 %v344_v1, %v344_v1 }
 0x231   :  { %424 = vmatmul.bf16.vlgmr.msrb.gmra.mxu0 %v345_v2 }
 0x232   :  { %v342_v3 = vpop.f32.mrf.mxu3 }
 0x2ae   :  { %v425_v7 = vpop.f32.mrf.mxu0 }
 0x2af   :  { %v426_v8 = vadd.f32 %v757_v6, %v425_v7 }
 0x2b1   :  { %v429_v9 = vmax.f32 %v426_v8, 0.0 }
 0x2b3   :  { %v430_v10 = vpack.c.bf16 %v429_v9, %v429_v9 }
 0x2b5   :  { %509 = vmatmul.bf16.vlgmr.msrb.gmra.mxu1 %v430_v10 }
 0x2b6   :  { %v427_v11 = vpop.f32.mrf.mxu0 }
 0x332   :  { %v510_v13 = vpop.f32.mrf.mxu1 }
 0x333   :  { %v511_v14 = vadd.f32 %v758_v12, %v510_v13 }
 0x335   :  { %514 = vst [vmem:[%s847_s4] sm:$0xff] %v511_v14 }
 0x33a   :  { %v512_v15 = vpop.f32.mrf.mxu1 }
 0x33b   :  { %523 = vsyncpa [#allocation3], 1 }

</bundles_post_ra>
